<compile_context>
chip_gen: v6e
topology: v6e:2x2x1
jax: 0.10.0
libtpu: 0.0.40
codegen_flags: <defaults>
</compile_context>

<pallas_src>
import jax
import jax.numpy as jnp
from jax import lax
from jax.experimental import pallas as pl
from jax.experimental.pallas import tpu as pltpu

LANE = 128


def _round_up(x, m):
    return ((x + m - 1) // m) * m


def _pad2d(x, rows, cols):
    r, c = x.shape
    return jnp.pad(x, ((0, rows - r), (0, cols - c)))


def _choose_tiles(n_pad):
    """Pick (tile_m, tile_k): as large as possible (<=512) while dividing n_pad.
    Keep >= 2 row tiles so the 'parallel' axis can shard across v7x's 2 TCs."""
    cands = [512, 384, 256, 128]
    tile_k = next(t for t in cands if t <= n_pad and n_pad % t == 0)
    tile_m = next((t for t in cands
                   if t <= n_pad and n_pad % t == 0 and n_pad // t >= 2),
                  min(n_pad, LANE))
    return tile_m, tile_k


# ----------------------------------------------------------------------------- #
# Kernel: mean aggregation + fused epilogue for one SAGEConv layer
#   acc = A_counts @ (x @ W_l)          (k-tiled reduction, f32 VMEM accumulator)
#   h   = acc * inv_deg + (x @ W_r + b) (exact f32 mean scale; root term precomputed)
#   h   = h * rsqrt(max(||h||^2, eps^2))  (normalize=True, torch eps=1e-12)
#   out = relu(h)
# ----------------------------------------------------------------------------- #
def sage_agg_kernel(a_ref, xl_ref, xr_ref, invdeg_ref, o_ref, acc_ref):
    k = pl.program_id(1)

    @pl.when(k == 0)
    def _init():
        acc_ref[...] = jnp.zeros_like(acc_ref)

    # bf16 counts x bf16 (x @ W_l) -> f32 accumulate on the MXU.
    acc_ref[...] += jnp.dot(a_ref[...], xl_ref[...],
                            preferred_element_type=jnp.float32)

    @pl.when(k == pl.num_programs(1) - 1)
    def _epilogue():
        # Exact f32 1/deg (counts are exact in bf16) + precomputed root transform
        # (pad rows of xr are zero, so padded rows come out exactly zero).
        h = acc_ref[...] * invdeg_ref[...] + xr_ref[...]
        sumsq = jnp.sum(h * h, axis=-1, keepdims=True)
        inv_norm = lax.rsqrt(jnp.maximum(sumsq, 1e-24))  # == 1/max(||h||, 1e-12)
        o_ref[...] = jnp.maximum(h * inv_norm, 0.0).astype(o_ref.dtype)


def sage_aggregate(a_counts, xl, xr, inv_deg, *, out_dtype=jnp.float32):
    """a_counts: [Np, Np] bf16, xl: [Np, Hp] bf16, xr: [Np, Hp] f32,
    inv_deg: [Np, 1] f32 -> [Np, Hp] out_dtype.  Np, Hp multiples of 128."""
    n_pad = a_counts.shape[0]
    h_pad = xl.shape[1]
    tile_m, tile_k = _choose_tiles(n_pad)
    n_i = n_pad // tile_m
    n_k = n_pad // tile_k

    flops = 2 * n_pad * n_pad * h_pad + 6 * n_pad * h_pad
    bytes_accessed = (
        a_counts.size * a_counts.dtype.itemsize
        + n_i * xl.size * xl.dtype.itemsize           # xl re-streamed per row tile
        + xr.size * xr.dtype.itemsize
        + inv_deg.size * inv_deg.dtype.itemsize
        + n_pad * h_pad * jnp.dtype(out_dtype).itemsize)

    return pl.pallas_call(
        sage_agg_kernel,
        out_shape=jax.ShapeDtypeStruct((n_pad, h_pad), out_dtype),
        grid=(n_i, n_k),
        in_specs=[
            pl.BlockSpec((tile_m, tile_k), lambda i, k: (i, k)),  # adjacency counts
            pl.BlockSpec((tile_k, h_pad), lambda i, k: (k, 0)),   # x @ W_l rows
            pl.BlockSpec((tile_m, h_pad), lambda i, k: (i, 0)),   # x @ W_r + b rows
            pl.BlockSpec((tile_m, 1), lambda i, k: (i, 0)),       # 1/deg per row
        ],
        out_specs=pl.BlockSpec((tile_m, h_pad), lambda i, k: (i, 0)),
        scratch_shapes=[pltpu.VMEM((tile_m, h_pad), jnp.float32)],
        compiler_params=pltpu.CompilerParams(
            dimension_semantics=("parallel", "arbitrary"),
            vmem_limit_bytes=32 * 1024 * 1024,
        ),
        cost_estimate=pl.CostEstimate(
            flops=flops, transcendentals=n_pad, bytes_accessed=bytes_accessed),
    )(a_counts, xl, xr, inv_deg)


# ----------------------------------------------------------------------------- #
# Host-side graph / parameter plumbing
# ----------------------------------------------------------------------------- #
def build_graph_operators(edge_index, n, n_pad):
    """Dense edge-multiplicity counts (small integers -> exact in bf16), exact f32
    per-row 1/deg mean scale, and a valid-row mask (pad rows and rows with no
    incoming edges aggregate to zero, matching PyG mean aggregation)."""
    src = edge_index[0]
    dst = edge_index[1]
    a = jnp.zeros((n_pad, n_pad), jnp.float32).at[dst, src].add(1.0)
    deg = jnp.zeros((n_pad,), jnp.float32).at[dst].add(1.0)
    inv_deg = (1.0 / jnp.maximum(deg, 1.0))[:, None]
    valid = (jnp.arange(n_pad) < n).astype(jnp.float32)[:, None]
    return a.astype(jnp.bfloat16), inv_deg, valid


def sage_layer(a_counts, inv_deg, valid, x, p):
    """One SAGEConv (mean agg, normalize=True) + ReLU.  The two weight GEMMs run
    as plain XLA f32 matmuls; only the aggregation + epilogue run in Pallas."""
    xl = jnp.dot(x, p["w_l"]).astype(jnp.bfloat16)
    xr = (jnp.dot(x, p["w_r"]) + p["b_l"]) * valid   # zero pad rows (incl. bias)
    return sage_aggregate(a_counts, xl, xr, inv_deg, out_dtype=jnp.float32)


def init_params(key, in_channels, hidden_channels):
    """Two SAGEConv layers: lin_l (with bias) on aggregated neighbors,
    lin_r (no bias) on the root node features."""
    ks = jax.random.split(key, 4)

    def glorot(k, fan_in, fan_out):
        lim = jnp.sqrt(6.0 / (fan_in + fan_out))
        return jax.random.uniform(k, (fan_in, fan_out), jnp.float32, -lim, lim)

    return {
        "conv1": {
            "w_l": glorot(ks[0], in_channels, hidden_channels),
            "b_l": jnp.zeros((1, hidden_channels), jnp.float32),
            "w_r": glorot(ks[1], in_channels, hidden_channels),
        },
        "conv2": {
            "w_l": glorot(ks[2], hidden_channels, hidden_channels),
            "b_l": jnp.zeros((1, hidden_channels), jnp.float32),
            "w_r": glorot(ks[3], hidden_channels, hidden_channels),
        },
    }


def gnn_encoder_forward(params, x, edge_index):
    """x: [N, F_in] f32, edge_index: [2, E] int32 -> [N, hidden] f32."""
    n, f_in = x.shape
    hidden = params["conv1"]["w_l"].shape[1]

    n_pad = _round_up(max(n, LANE), LANE)
    f_pad = _round_up(f_in, LANE)
    h_pad = _round_up(hidden, LANE)

    a_counts, inv_deg, valid = build_graph_operators(edge_index, n, n_pad)
    x_p = _pad2d(x, n_pad, f_pad)

    p1 = {"w_l": _pad2d(params["conv1"]["w_l"], f_pad, h_pad),
          "w_r": _pad2d(params["conv1"]["w_r"], f_pad, h_pad),
          "b_l": _pad2d(params["conv1"]["b_l"], 1, h_pad)}
    p2 = {"w_l": _pad2d(params["conv2"]["w_l"], h_pad, h_pad),
          "w_r": _pad2d(params["conv2"]["w_r"], h_pad, h_pad),
          "b_l": _pad2d(params["conv2"]["b_l"], 1, h_pad)}

    h1 = sage_layer(a_counts, inv_deg, valid, x_p, p1)
    h2 = sage_layer(a_counts, inv_deg, valid, h1, p2)
    return h2[:n, :hidden]


def gnn_encoder_reference(params, x, edge_index):
    """Pure-JAX f32 reference (unpadded, exact divide) for a tolerance check."""
    n = x.shape[0]
    src, dst = edge_index[0], edge_index[1]
    a = jnp.zeros((n, n), jnp.float32).at[dst, src].add(1.0)
    deg = jnp.zeros((n,), jnp.float32).at[dst].add(1.0)
    a = a / jnp.maximum(deg, 1.0)[:, None]

    def layer(h, p):
        out = a @ h @ p["w_l"] + p["b_l"] + h @ p["w_r"]
        norm = jnp.sqrt(jnp.sum(out * out, axis=-1, keepdims=True))
        out = out / jnp.maximum(norm, 1e-12)
        return jnp.maximum(out, 0.0)

    h = layer(x, params["conv1"])
    return layer(h, params["conv2"])


if __name__ == "__main__":
    key = jax.random.PRNGKey(0)
    k_x, k_e, k_p = jax.random.split(key, 3)

    N = 200          # number of nodes  (padded to 256 -> grid (2, 1))
    F_IN = 16        # input feature dim (lazy (-1,-1) in PyG -> inferred)
    HIDDEN = 32      # hidden_channels
    E = 800          # number of edges

    x = jax.random.normal(k_x, (N, F_IN), jnp.float32)
    edge_index = jax.random.randint(k_e, (2, E), 0, N, jnp.int32)
    params = init_params(k_p, F_IN, HIDDEN)

    out = jax.jit(gnn_encoder_forward)(params, x, edge_index)
    jax.block_until_ready(out)

    assert out.shape == (N, HIDDEN)
    assert out.dtype == jnp.float32

    # bf16 aggregation operands / f32 accumulate + exact f32 1/deg vs f32 reference.
    ref = gnn_encoder_reference(params, x, edge_index)
    max_err = float(jnp.max(jnp.abs(out - ref)))
    assert max_err < 0.03, f"mismatch vs reference: max abs err {max_err}"

    print("KERNEL_OK")
</pallas_src>

<mosaic_0001>
module attributes {stable_mosaic.version = 11 : i64} {
  func.func private @main(%arg0: i32) attributes {dimension_semantics = [#tpu.dimension_semantics<core_parallel>], iteration_bounds = array<i64: 2>, tpu.core_type = #tpu.core_type<sc_scalar_subcore>, window_params = []} {
    return
  }
}

module attributes {stable_mosaic.version = 11 : i64} {
  func.func private @main(%arg0: i32) attributes {dimension_semantics = [#tpu.dimension_semantics<core_parallel>], iteration_bounds = array<i64: 2>, tpu.core_type = #tpu.core_type<sc_scalar_subcore>, window_params = []} {
    return
  }
}

module attributes {stable_mosaic.version = 11 : i64} {
  func.func @sage_agg_kernel(%arg0: i32, %arg1: i32, %arg2: memref<128x256xbf16, #tpu.memory_space<vmem>>, %arg3: memref<256x128xbf16, #tpu.memory_space<vmem>>, %arg4: memref<128x128xf32, #tpu.memory_space<vmem>>, %arg5: memref<128x1xf32, #tpu.memory_space<vmem>>, %arg6: memref<128x128xf32, #tpu.memory_space<vmem>>, %arg7: memref<128x128xf32, #tpu.memory_space<vmem>>) attributes {dimension_semantics = [#tpu.dimension_semantics<parallel>, #tpu.dimension_semantics<arbitrary>], iteration_bounds = array<i64: 2, 1>, scalar_prefetch = 0 : i64, scratch_operands = 1 : i64, tpu.core_type = #tpu.core_type<tc>, window_params = [{transform_indices = @transform_0, window_bounds = array<i64: 128, 256>}, {transform_indices = @transform_1, window_bounds = array<i64: 256, 128>}, {transform_indices = @transform_2, window_bounds = array<i64: 128, 128>}, {transform_indices = @transform_3, window_bounds = array<i64: 128, 1>}, {transform_indices = @transform_4, window_bounds = array<i64: 128, 128>}]} {
    %c0_i32 = arith.constant 0 : i32
    %0 = arith.cmpi eq, %arg1, %c0_i32 : i32
    %1 = arith.extui %0 : i1 to i32
    %c0_i32_0 = arith.constant 0 : i32
    %2 = arith.cmpi ne, %1, %c0_i32_0 : i32
    scf.if %2 {
      %cst_10 = arith.constant 0.000000e+00 : f32
      %12 = vector.broadcast %cst_10 : f32 to vector<128x128xf32>
      %c0_11 = arith.constant 0 : index
      %c0_12 = arith.constant 0 : index
      %13 = vector.load %arg7[%c0_11, %c0_12] : memref<128x128xf32, #tpu.memory_space<vmem>>, vector<128x128xf32>
      tpu.vector_store %arg7[%c0_11, %c0_12], %12 {strides = array<i32>} : memref<128x128xf32, #tpu.memory_space<vmem>>, vector<128x128xf32>,
    } else {
    }
    %c0 = arith.constant 0 : index
    %c0_1 = arith.constant 0 : index
    %3 = vector.load %arg7[%c0, %c0_1] : memref<128x128xf32, #tpu.memory_space<vmem>>, vector<128x128xf32>
    %c0_2 = arith.constant 0 : index
    %c0_3 = arith.constant 0 : index
    %4 = vector.load %arg2[%c0_2, %c0_3] : memref<128x256xbf16, #tpu.memory_space<vmem>>, vector<128x256xbf16>
    %c0_4 = arith.constant 0 : index
    %c0_5 = arith.constant 0 : index
    %5 = vector.load %arg3[%c0_4, %c0_5] : memref<256x128xbf16, #tpu.memory_space<vmem>>, vector<256x128xbf16>
    %cst = arith.constant dense<0.000000e+00> : vector<128x128xf32>
    %6 = tpu.matmul %4, %5, %cst {dimension_numbers = #tpu.dot_dimension_numbers<[1], [0], [0], [1], [0, 0, 1, 1], [], []>} : vector<128x256xbf16>, vector<256x128xbf16>, vector<128x128xf32> -> vector<128x128xf32>
    %7 = arith.addf %3, %6 : vector<128x128xf32>
    %c0_6 = arith.constant 0 : index
    %c0_7 = arith.constant 0 : index
    %8 = vector.load %arg7[%c0_6, %c0_7] : memref<128x128xf32, #tpu.memory_space<vmem>>, vector<128x128xf32>
    tpu.vector_store %arg7[%c0_6, %c0_7], %7 {strides = array<i32>} : memref<128x128xf32, #tpu.memory_space<vmem>>, vector<128x128xf32>,
    %c0_i32_8 = arith.constant 0 : i32
    %9 = arith.cmpi eq, %arg1, %c0_i32_8 : i32
    %10 = arith.extui %9 : i1 to i32
    %c0_i32_9 = arith.constant 0 : i32
    %11 = arith.cmpi ne, %10, %c0_i32_9 : i32
    scf.if %11 {
      %c0_10 = arith.constant 0 : index
      %c0_11 = arith.constant 0 : index
      %12 = vector.load %arg7[%c0_10, %c0_11] : memref<128x128xf32, #tpu.memory_space<vmem>>, vector<128x128xf32>
      %c0_12 = arith.constant 0 : index
      %c0_13 = arith.constant 0 : index
      %13 = vector.load %arg5[%c0_12, %c0_13] : memref<128x1xf32, #tpu.memory_space<vmem>>, vector<128x1xf32>
      %14 = vector.broadcast %13 : vector<128x1xf32> to vector<128x128xf32>
      %15 = arith.mulf %12, %14 : vector<128x128xf32>
      %c0_14 = arith.constant 0 : index
      %c0_15 = arith.constant 0 : index
      %16 = vector.load %arg4[%c0_14, %c0_15] : memref<128x128xf32, #tpu.memory_space<vmem>>, vector<128x128xf32>
      %17 = arith.addf %15, %16 : vector<128x128xf32>
      %18 = arith.mulf %17, %17 : vector<128x128xf32>
      %cst_16 = arith.constant dense<0.000000e+00> : vector<128xf32>
      %19 = vector.multi_reduction <add>, %18, %cst_16 [1] : vector<128x128xf32> to vector<128xf32>
      %20 = vector.shape_cast %19 : vector<128xf32> to vector<128x1xf32>
      %cst_17 = arith.constant 1.000000e-24 : f32
      %21 = vector.broadcast %cst_17 : f32 to vector<128x1xf32>
      %22 = arith.maximumf %20, %21 : vector<128x1xf32>
      %23 = math.rsqrt %22 : vector<128x1xf32>
      %24 = vector.broadcast %23 : vector<128x1xf32> to vector<128x128xf32>
      %25 = arith.mulf %17, %24 : vector<128x128xf32>
      %cst_18 = arith.constant 0.000000e+00 : f32
      %26 = vector.broadcast %cst_18 : f32 to vector<128x128xf32>
      %27 = arith.maximumf %25, %26 : vector<128x128xf32>
      %c0_19 = arith.constant 0 : index
      %c0_20 = arith.constant 0 : index
      %28 = vector.load %arg6[%c0_19, %c0_20] : memref<128x128xf32, #tpu.memory_space<vmem>>, vector<128x128xf32>
      tpu.vector_store %arg6[%c0_19, %c0_20], %27 {strides = array<i32>} : memref<128x128xf32, #tpu.memory_space<vmem>>, vector<128x128xf32>,
    } else {
    }
    return
  }
  func.func @transform_0(%arg0: i32, %arg1: i32) -> (i32, i32) {
    %c0_i32 = arith.constant 0 : i32
    return %arg0, %arg1 : i32, i32
  }
  func.func @transform_1(%arg0: i32, %arg1: i32) -> (i32, i32) {
    %c0_i32 = arith.constant 0 : i32
    %c0_i32_0 = arith.constant 0 : i32
    return %arg1, %c0_i32 : i32, i32
  }
  func.func @transform_2(%arg0: i32, %arg1: i32) -> (i32, i32) {
    %c0_i32 = arith.constant 0 : i32
    %c0_i32_0 = arith.constant 0 : i32
    return %arg0, %c0_i32 : i32, i32
  }
  func.func @transform_3(%arg0: i32, %arg1: i32) -> (i32, i32) {
    %c0_i32 = arith.constant 0 : i32
    %c0_i32_0 = arith.constant 0 : i32
    return %arg0, %c0_i32 : i32, i32
  }
  func.func @transform_4(%arg0: i32, %arg1: i32) -> (i32, i32) {
    %c0_i32 = arith.constant 0 : i32
    %c0_i32_0 = arith.constant 0 : i32
    return %arg0, %c0_i32 : i32, i32
  }
}

</mosaic_0001>

<bundles_post_ra>
// kernel: gnn_encoder_forward.2
= control target key start
LH: loop header
LB: loop body
LE: loop exit
PB: predicated region body
PF: predicated region fallthrough
CT: control target
= control target key end

     0   :  { %s1368_s15 = smov 0   ;;  %s1370_s16 = smov 0   ;;  %s1631_s0 = inlined_call_operand.vmem [shape: bf16[256,256], index: 0, kind: input, shape index: {}]   ;;  %s1632_s1 = inlined_call_operand.vmem [shape: bf16[256,128], index: 1, kind: input, shape index: {}]   ;;  %s1633_s2 = inlined_call_operand.vmem [shape: f32[256,128], index: 2, kind: input, shape index: {}]   ;;  %s1634_s3 = inlined_call_operand.vmem [shape: f32[256,1], index: 3, kind: input, shape index: {}]   ;;  %s1635_s4 = inlined_call_operand.vmem [shape: f32[256,128], index: 4, kind: output, shape index: {}]  }
   0x1   :  { %s1372_s17 = smov 0  }
   0x2 LB: > { %s26_s18 = sadd.s32 1, %s1336_s16  ;;  %p1094_p0 = scmp.ge.s32.totalorder %s1340_s17, 1  ;;  %s1340_s17 = sphi %s1372_s17, %s14_s17   ;;  %s1336_s16 = sphi %s1370_s16, %s1637_s16   ;;  %s1332_s15 = sphi %s1368_s15, %s1636_s15  }
   0x3   : > { %p28_p1 = scmp.ge.s32.totalorder %s26_s18, 2  ;;  %p216_p2 = scmp.lt.s32.totalorder %s1340_s17, 3 }
   0x5   : > { %s1639_s18 = smov (%p28_p1, %s26_s18), 0  ;;  %p217_p3 = pnand %p1094_p0, %p216_p2 }
   0x6   : > { %s1095_s21 = sshll.u32 (!%p217_p3), %s1332_s15, 4 }
   0x7   : > { %220 = sbr.rel (%p217_p3) target bundleno = 440 (0x1b8), region = 36  ;;  %p264_p4 = scmp.lt.s32.totalorder (!%p217_p3), %s1095_s21, 31 }
   0xc   : > { %v1246_v0 = vld [vmem:[%s1632_s1 + $0x78] sm:$0xff]   ;;  %v1248_v2 = vld [vmem:[%s1632_s1 + $0x70] sm:$0xff]   ;;  %v1250_v4 = vld [vmem:[%s1632_s1 + $0x68] sm:$0xff]   ;;  %v1342_v5 = vmov 0   ;;  %s1641_s21 = smov (!%p264_p4, %s1095_s21), 31 }
   0xd   : > { %v1247_v1 = vld [vmem:[%s1632_s1 + $0x38] sm:$0xff]   ;;  %1139 = vmatprep.subr.bf16.mxu0 %v1246_v0  ;;  %1203 = vmatprep.subr.bf16.mxu1 %v1246_v0  ;;  %v1249_v3 = vld [vmem:[%s1632_s1 + $0x30] sm:$0xff]   ;;  %v1251_v6 = vld [vmem:[%s1632_s1 + $0x28] sm:$0xff]   ;;  %s1413_s10 = sshll.u32 %s1641_s21, 3 }
   0xe   : > { %1140 = vmatpush3.bf16.msra.mxu0 %v1247_v1  ;;  %1211 = vmatpush3.bf16.msra.mxu1 %v1247_v1  ;;  %v1252_v7 = vld [vmem:[%s1632_s1 + $0x60] sm:$0xff]   ;;  %v1254_v9 = vld [vmem:[%s1632_s1 + $0x58] sm:$0xff]   ;;  %s1422_s15 = scalar_lea.vmem %s1631_s0, %s1413_s10  ;;  %v1256_v11 = vld [vmem:[%s1632_s1 + $0x50] sm:$0xff]   ;;  %s1445_s5 = scalar_lea.vmem %s1634_s3, %s1413_s10 }
   0xf   : > { %1141 = vmatprep.subr.bf16.mxu0 %v1248_v2  ;;  %1204 = vmatprep.subr.bf16.mxu1 %v1248_v2  ;;  %v1253_v8 = vld [vmem:[%s1632_s1 + $0x20] sm:$0xff]   ;;  %v1255_v10 = vld [vmem:[%s1632_s1 + $0x18] sm:$0xff]   ;;  %v1257_v14 = vld [vmem:[%s1632_s1 + $0x10] sm:$0xff]   ;;  %s1497_s13 = scalar_lea.vmem %s1633_s2, %s1413_s10  ;;  %s1589_s19 = scalar_lea.vmem %s1635_s4, %s1413_s10 }
  0x10   : > { %1245 = vset.pattern.permute.xlu1 %v1342_v5  ;;  %1244 = vset.pattern.permute.xlu0 %v1342_v5  ;;  %v1264_v12 = vld [vmem:[%s1422_s15 + $0x4] ss:$8 sps:$4 sm:$0xff]   ;;  %v709_v18 = vld [vmem:[%s1445_s5 + $0x10] sm:$0xff]  ;;  %v1262_v21 = vld [vmem:[%s1422_s15] ss:$8 sps:$4 sm:$0xff]  }
  0x11   : > { %v1267_v13 = vld [vmem:[%s1422_s15 + $0x44] ss:$8 sps:$4 sm:$0xff]   ;;  %591 = vmatprep.mubr.bf16.mxu0 %v1264_v12  ;;  %735 = vperm.xlu1 %1245, %v709_v18   ;;  %v1265_v22 = vld [vmem:[%s1422_s15 + $0x40] ss:$8 sps:$4 sm:$0xff]   ;;  %v710_v23 = vld [vmem:[%s1445_s5 + $0x18] sm:$0xff] }
  0x12   : > { %1142 = vmatpush3.bf16.msra.mxu0 %v1249_v3  ;;  %1212 = vmatpush3.bf16.msra.mxu1 %v1249_v3  ;;  %v1258_v15 = vld [vmem:[%s1632_s1 + $0x48] sm:$0xff]   ;;  %v1260_v17 = vld [vmem:[%s1632_s1 + $0x40] sm:$0xff]   ;;  %v1268_v25 = vld [vmem:[%s1422_s15 + $0x14] ss:$8 sps:$4 sm:$0xff]  }
  0x13   : > { %1143 = vmatprep.subr.bf16.mxu0 %v1250_v4  ;;  %1205 = vmatprep.subr.bf16.mxu1 %v1250_v4  ;;  %v1259_v16 = vld [vmem:[%s1632_s1 + $0x8] sm:$0xff]   ;;  %v1261_v19 = vld [vmem:[%s1632_s1] sm:$0xff]   ;;  %v1270_v26 = vld [vmem:[%s1422_s15 + $0x54] ss:$8 sps:$4 sm:$0xff]  }
  0x14   : > { %623 = vmatprep.mubr.bf16.mxu1 %v1267_v13  ;;  %v707_v20 = vld [vmem:[%s1445_s5] sm:$0xff]  ;;  %v708_v24 = vld [vmem:[%s1445_s5 + $0x8] sm:$0xff]  ;;  %v1272_v29 = vld [vmem:[%s1422_s15 + $0x10] ss:$8 sps:$4 sm:$0xff]  }
  0x15   : > { %725 = vperm.xlu0 %1244, %v707_v20   ;;  %740 = vperm.xlu1 %1245, %v710_v23   ;;  %v712_v27 = vld [vmem:[%s1445_s5 + $0x28] sm:$0xff]  ;;  %v711_v28 = vld [vmem:[%s1445_s5 + $0x20] sm:$0xff]  ;;  %v1273_v30 = vld [vmem:[%s1422_s15 + $0x50] ss:$8 sps:$4 sm:$0xff]  }
  0x16   : > { %1144 = vmatpush3.bf16.msra.mxu0 %v1251_v6  ;;  %1213 = vmatpush3.bf16.msra.mxu1 %v1251_v6  ;;  %v714_v31 = vld [vmem:[%s1445_s5 + $0x38] sm:$0xff]  ;;  %v713_v32 = vld [vmem:[%s1445_s5 + $0x30] sm:$0xff]  ;;  %v1274_v33 = vld [vmem:[%s1422_s15 + $0x24] ss:$8 sps:$4 sm:$0xff]  }
  0x17   : > { %1145 = vmatprep.subr.bf16.mxu0 %v1252_v7  ;;  %1206 = vmatprep.subr.bf16.mxu1 %v1252_v7  ;;  %v1276_v34 = vld [vmem:[%s1422_s15 + $0x64] ss:$8 sps:$4 sm:$0xff]   ;;  %v1278_v37 = vld [vmem:[%s1422_s15 + $0x20] ss:$8 sps:$4 sm:$0xff]   ;;  %v718_v39 = vld [vmem:[%s1445_s5 + $0x58] sm:$0xff] }
  0x18   : > { %v716_v35 = vld [vmem:[%s1445_s5 + $0x48] sm:$0xff]  ;;  %v715_v36 = vld [vmem:[%s1445_s5 + $0x40] sm:$0xff]  ;;  %v717_v40 = vld [vmem:[%s1445_s5 + $0x50] sm:$0xff] }
  0x19   : > { %730 = vperm.xlu0 %1244, %v708_v24   ;;  %750 = vperm.xlu1 %1245, %v712_v27   ;;  %v1279_v38 = vld [vmem:[%s1422_s15 + $0x60] ss:$8 sps:$4 sm:$0xff]   ;;  %v1280_v41 = vld [vmem:[%s1422_s15 + $0x34] ss:$8 sps:$4 sm:$0xff]   ;;  %v1284_v45 = vld [vmem:[%s1422_s15 + $0x30] ss:$8 sps:$4 sm:$0xff]  }
  0x1a   : > { %1146 = vmatpush3.bf16.msra.mxu0 %v1253_v8  ;;  %1214 = vmatpush3.bf16.msra.mxu1 %v1253_v8  ;;  %v1282_v42 = vld [vmem:[%s1422_s15 + $0x74] ss:$8 sps:$4 sm:$0xff]   ;;  %v720_v43 = vld [vmem:[%s1445_s5 + $0x68] sm:$0xff]  ;;  %v719_v44 = vld [vmem:[%s1445_s5 + $0x60] sm:$0xff] }
  0x1b   : > { %1147 = vmatprep.subr.bf16.mxu0 %v1254_v9  ;;  %1207 = vmatprep.subr.bf16.mxu1 %v1254_v9  ;;  %v1285_v46 = vld [vmem:[%s1422_s15 + $0x70] ss:$8 sps:$4 sm:$0xff]   ;;  %v827_v2 = vld [vmem:[%s1497_s13 + $0x40] sm:$0xff]  ;;  %v828_v20 = vld [vmem:[%s1497_s13 + $0x48] sm:$0xff] }
  0x1c   : > { %v722_v47 = vld [vmem:[%s1445_s5 + $0x78] sm:$0xff]  ;;  %v721_v48 = vld [vmem:[%s1445_s5 + $0x70] sm:$0xff]  ;;  %v819_v3 = vld [vmem:[%s1497_s13] sm:$0xff] }
  0x1d   : > { %745 = vperm.xlu0 %1244, %v711_v28   ;;  %760 = vperm.xlu1 %1245, %v714_v31   ;;  %v821_v31 = vld [vmem:[%s1497_s13 + $0x10] sm:$0xff] }
  0x1e   : > { %1148 = vmatpush3.bf16.msra.mxu0 %v1255_v10  ;;  %1215 = vmatpush3.bf16.msra.mxu1 %v1255_v10 }
  0x1f   : > { %1149 = vmatprep.subr.bf16.mxu0 %v1256_v11  ;;  %1208 = vmatprep.subr.bf16.mxu1 %v1256_v11 }
  0x21   : > { %755 = vperm.xlu0 %1244, %v713_v32   ;;  %770 = vperm.xlu1 %1245, %v716_v35  }
  0x22   : > { %1150 = vmatpush3.bf16.msra.mxu0 %v1257_v14  ;;  %1216 = vmatpush3.bf16.msra.mxu1 %v1257_v14 }
  0x23   : > { %1151 = vmatprep.subr.bf16.mxu0 %v1258_v15  ;;  %1209 = vmatprep.subr.bf16.mxu1 %v1258_v15  ;;  %v820_v15 = vld [vmem:[%s1497_s13 + $0x8] sm:$0xff] }
  0x25   : > { %765 = vperm.xlu0 %1244, %v715_v36   ;;  %780 = vperm.xlu1 %1245, %v718_v39  }
  0x26   : > { %1152 = vmatpush3.bf16.msra.mxu0 %v1259_v16  ;;  %1217 = vmatpush3.bf16.msra.mxu1 %v1259_v16 }
  0x27   : > { %1153 = vmatprep.subr.bf16.mxu0 %v1260_v17  ;;  %1210 = vmatprep.subr.bf16.mxu1 %v1260_v17 }
  0x29   : > { %775 = vperm.xlu0 %1244, %v717_v40   ;;  %790 = vperm.xlu1 %1245, %v720_v43  }
  0x2a   : > { %1154 = vmatpush3.bf16.msra.mxu0 %v1261_v19  ;;  %1218 = vmatpush3.bf16.msra.mxu1 %v1261_v19 }
  0x2d   : > { %592 = vmatmul.mubr.bf16.vlgmr.msra.gmra.mxu0 %v1262_v21  ;;  %624 = vmatmul.mubr.bf16.vlgmr.msra.gmra.mxu1 %v1265_v22 }
  0x2e   : > { %599 = vmatprep.mubr.bf16.mxu0 %v1268_v25  ;;  %631 = vmatprep.mubr.bf16.mxu1 %v1270_v26 }
  0x2f   : > { %785 = vperm.xlu0 %1244, %v719_v44   ;;  %800 = vperm.xlu1 %1245, %v722_v47   ;;  %v822_v44 = vld [vmem:[%s1497_s13 + $0x18] sm:$0xff] }
  0x33   : > { %795 = vperm.xlu0 %1244, %v721_v48  }
  0x35   : > { %600 = vmatmul.mubr.bf16.gmra.mxu0 %v1272_v29  ;;  %632 = vmatmul.mubr.bf16.gmra.mxu1 %v1273_v30  ;;  %v829_v30 = vld [vmem:[%s1497_s13 + $0x50] sm:$0xff] }
  0x36   : > { %607 = vmatprep.mubr.bf16.mxu0 %v1274_v33  ;;  %639 = vmatprep.mubr.bf16.mxu1 %v1276_v34 }
  0x3d   : > { %608 = vmatmul.mubr.bf16.gmra.mxu0 %v1278_v37  ;;  %640 = vmatmul.mubr.bf16.gmra.mxu1 %v1279_v38 }
  0x3e   : > { %615 = vmatprep.mubr.bf16.mxu0 %v1280_v41  ;;  %647 = vmatprep.mubr.bf16.mxu1 %v1282_v42 }
  0x45   : > { %616 = vmatmul.mubr.bf16.gmra.mxu0 %v1284_v45  ;;  %648 = vmatmul.mubr.bf16.gmra.mxu1 %v1285_v46 }
  0x8c   : > { %v736_v50 = vpop.permute.xlu1 %735 }
  0x90   : > { %v726_v49 = vpop.permute.xlu0 %725  ;;  %v1483_v52 = vpop.permute.xlu1 %740 }
  0x94   : > { %v731_v51 = vpop.permute.xlu0 %730  ;;  %v1487_v54 = vpop.permute.xlu1 %750 }
  0x98   : > { %v1485_v53 = vpop.permute.xlu0 %745  ;;  %v1491_v58 = vpop.permute.xlu1 %760 }
  0x9c   : > { %v1489_v55 = vpop.permute.xlu0 %755  ;;  %v771_v8 = vpop.permute.xlu1 %770 }
  0xa0   : > { %v766_v61 = vpop.permute.xlu0 %765  ;;  %v781_v45 = vpop.permute.xlu1 %780 }
  0xa4   : > { %v776_v23 = vpop.permute.xlu0 %775 }
  0xed   : > { %v1155_v56 = vpop.f32.mrf.mxu0  ;;  %v1179_v57 = vpop.f32.mrf.mxu1 }
  0xef   : > { %v1156_v59 = vpop.f32.mrf.mxu0  ;;  %v1180_v60 = vpop.f32.mrf.mxu1 }
  0xf0   : > { %v1157_v62 = vadd.f32 %v1156_v59, %v1155_v56  ;;  %v1181_v63 = vadd.f32 %v1180_v60, %v1179_v57  ;;  %v786_v56 = vpop.permute.xlu0 %785 }
  0xf1   : > { %v1158_v0 = vpop.f32.mrf.mxu0  ;;  %v1182_v1 = vpop.f32.mrf.mxu1 }
  0xf2   : > { %v803_v4 = vmul.f32 %v1157_v62, %v726_v49  ;;  %v811_v5 = vmul.f32 %v1181_v63, %v766_v61  ;;  %v830_v61 = vld [vmem:[%s1497_s13 + $0x58] sm:$0xff]  ;;  %v823_v63 = vld [vmem:[%s1497_s13 + $0x20] sm:$0xff] }
  0xf3   : > { %v1159_v6 = vpop.f32.mrf.mxu0  ;;  %v1183_v7 = vpop.f32.mrf.mxu1 }
  0xf4   : > { %v1160_v9 = vadd.f32 %v1159_v6, %v1158_v0  ;;  %v1184_v10 = vadd.f32 %v1183_v7, %v1182_v1  ;;  %v1501_v11 = vadd.f32 %v827_v2, %v811_v5  ;;  %v1503_v12 = vadd.f32 %v819_v3, %v803_v4  ;;  %v831_v6 = vld [vmem:[%s1497_s13 + $0x60] sm:$0xff] }
  0xf5   : > { %v1161_v13 = vpop.f32.mrf.mxu0  ;;  %v1185_v14 = vpop.f32.mrf.mxu1 }
  0xf6   : > { %v804_v16 = vmul.f32 %v1160_v9, %v731_v51  ;;  %v812_v17 = vmul.f32 %v1184_v10, %v771_v8  ;;  %v859_v18 = vmul.f32 %v1501_v11, %v1501_v11  ;;  %v851_v19 = vmul.f32 %v1503_v12, %v1503_v12 }
  0xf7   : > { %v1162_v21 = vpop.f32.mrf.mxu0  ;;  %v1186_v22 = vpop.f32.mrf.mxu1 }
  0xf8   : > { %v1163_v24 = vadd.f32 %v1162_v21, %v1161_v13  ;;  %v1187_v25 = vadd.f32 %v1186_v22, %v1185_v14  ;;  %883 = vadd.xlane.f32.xlu1 %v859_v18  ;;  %867 = vadd.xlane.f32.xlu0 %v851_v19  ;;  %v1511_v26 = vadd.f32 %v820_v15, %v804_v16  ;;  %v824_v14 = vld [vmem:[%s1497_s13 + $0x28] sm:$0xff]  ;;  %v791_v15 = vpop.permute.xlu1 %790  ;;  %v796_v22 = vpop.permute.xlu0 %795 }
  0xf9   : > { %v1164_v27 = vpop.f32.mrf.mxu0  ;;  %v1188_v28 = vpop.f32.mrf.mxu1  ;;  %v1513_v29 = vadd.f32 %v828_v20, %v812_v17 }
  0xfa   : > { %v805_v32 = vmul.f32 %v1163_v24, %v736_v50  ;;  %v813_v33 = vmul.f32 %v1187_v25, %v776_v23  ;;  %v852_v34 = vmul.f32 %v1511_v26, %v1511_v26 }
  0xfb   : > { %v1165_v35 = vpop.f32.mrf.mxu0  ;;  %v1189_v36 = vpop.f32.mrf.mxu1  ;;  %v860_v37 = vmul.f32 %v1513_v29, %v1513_v29 }
  0xfc   : > { %v1166_v38 = vadd.f32 %v1165_v35, %v1164_v27  ;;  %v1190_v39 = vadd.f32 %v1189_v36, %v1188_v28  ;;  %869 = vadd.xlane.f32.xlu1 %v852_v34  ;;  %v1521_v40 = vadd.f32 %v829_v30, %v813_v33  ;;  %v1523_v41 = vadd.f32 %v821_v31, %v805_v32  ;;  %v825_v30 = vld [vmem:[%s1497_s13 + $0x30] sm:$0xff] }
  0xfd   : > { %885 = vadd.xlane.f32.xlu0 %v860_v37  ;;  %v1167_v42 = vpop.f32.mrf.mxu0  ;;  %v1191_v43 = vpop.f32.mrf.mxu1 }
  0xfe   : > { %v806_v46 = vmul.f32 %v1166_v38, %v1483_v52  ;;  %v861_v47 = vmul.f32 %v1521_v40, %v1521_v40  ;;  %v853_v48 = vmul.f32 %v1523_v41, %v1523_v41  ;;  %v814_v49 = vmul.f32 %v1190_v39, %v781_v45  ;;  %v833_v38 = vld [vmem:[%s1497_s13 + $0x70] sm:$0xff] }
  0xff   : > { %v1168_v50 = vpop.f32.mrf.mxu0  ;;  %v1192_v51 = vpop.f32.mrf.mxu1 }
 0x100   : > { %v1169_v57 = vadd.f32 %v1168_v50, %v1167_v42  ;;  %v1193_v59 = vadd.f32 %v1192_v51, %v1191_v43  ;;  %887 = vadd.xlane.f32.xlu1 %v861_v47  ;;  %v1531_v60 = vadd.f32 %v822_v44, %v806_v46  ;;  %v1538_v5 = vadd.f32 %v830_v61, %v814_v49  ;;  %v801_v44 = vpop.permute.xlu1 %800  ;;  %v834_v51 = vld [vmem:[%s1497_s13 + $0x78] sm:$0xff] }
 0x101   : > { %871 = vadd.xlane.f32.xlu0 %v853_v48  ;;  %v1170_v62 = vpop.f32.mrf.mxu0  ;;  %v1194_v52 = vpop.f32.mrf.mxu1 }
 0x102   : > { %v807_v0 = vmul.f32 %v1169_v57, %v1485_v53  ;;  %v815_v1 = vmul.f32 %v1193_v59, %v786_v56  ;;  %v854_v2 = vmul.f32 %v1531_v60, %v1531_v60  ;;  %v862_v21 = vmul.f32 %v1538_v5, %v1538_v5 }
 0x103   : > { %v1171_v3 = vpop.f32.mrf.mxu0  ;;  %v1195_v4 = vpop.f32.mrf.mxu1 }
 0x104   : > { %v1172_v7 = vadd.f32 %v1171_v3, %v1170_v62  ;;  %v1196_v8 = vadd.f32 %v1195_v4, %v1194_v52  ;;  %v1541_v9 = vadd.f32 %v823_v63, %v807_v0  ;;  %v1547_v17 = vadd.f32 %v831_v6, %v815_v1 }
 0x105   : > { %873 = vadd.xlane.f32.xlu0 %v854_v2  ;;  %v1173_v10 = vpop.f32.mrf.mxu0  ;;  %v1197_v13 = vpop.f32.mrf.mxu1 }
 0x106   : > { %v808_v53 = vmul.f32 %v1172_v7, %v1487_v54  ;;  %v855_v16 = vmul.f32 %v1541_v9, %v1541_v9  ;;  %v816_v18 = vmul.f32 %v1196_v8, %v791_v15  ;;  %v832_v54 = vld [vmem:[%s1497_s13 + $0x68] sm:$0xff]  ;;  %v863_v33 = vmul.f32 %v1547_v17, %v1547_v17 }
 0x107   : > { %v1174_v19 = vpop.f32.mrf.mxu0  ;;  %v1198_v20 = vpop.f32.mrf.mxu1 }
 0x108   : > { %v1175_v23 = vadd.f32 %v1174_v19, %v1173_v10  ;;  %v1199_v24 = vadd.f32 %v1198_v20, %v1197_v13  ;;  %875 = vadd.xlane.f32.xlu1 %v855_v16  ;;  %v1551_v25 = vadd.f32 %v824_v14, %v808_v53  ;;  %v1560_v37 = vadd.f32 %v832_v54, %v816_v18 }
 0x109   : > { %889 = vadd.xlane.f32.xlu0 %v862_v21  ;;  %v1176_v27 = vpop.f32.mrf.mxu0  ;;  %v1200_v28 = vpop.f32.mrf.mxu1 }
 0x10a   : > { %v809_v31 = vmul.f32 %v1175_v23, %v1489_v55  ;;  %v817_v32 = vmul.f32 %v1199_v24, %v796_v22  ;;  %v856_v34 = vmul.f32 %v1551_v25, %v1551_v25  ;;  %v826_v55 = vld [vmem:[%s1497_s13 + $0x38] sm:$0xff]  ;;  %v864_v49 = vmul.f32 %v1560_v37, %v1560_v37 }
 0x10b   : > { %v1177_v35 = vpop.f32.mrf.mxu0  ;;  %v1201_v36 = vpop.f32.mrf.mxu1 }
 0x10c   : > { %v1178_v39 = vadd.f32 %v1177_v35, %v1176_v27  ;;  %v1202_v42 = vadd.f32 %v1201_v36, %v1200_v28  ;;  %891 = vadd.xlane.f32.xlu1 %v863_v33  ;;  %v1563_v43 = vadd.f32 %v825_v30, %v809_v31  ;;  %v1569_v47 = vadd.f32 %v833_v38, %v817_v32 }
 0x10d   : > { %877 = vadd.xlane.f32.xlu0 %v856_v34 }
 0x10e   : > { %v810_v45 = vmul.f32 %v1178_v39, %v1491_v58  ;;  %v857_v46 = vmul.f32 %v1563_v43, %v1563_v43  ;;  %v818_v48 = vmul.f32 %v1202_v42, %v801_v44  ;;  %v865_v56 = vmul.f32 %v1569_v47, %v1569_v47 }
 0x110   : > { %879 = vadd.xlane.f32.xlu1 %v857_v46  ;;  %v1573_v50 = vadd.f32 %v826_v55, %v810_v45  ;;  %v1580_v57 = vadd.f32 %v834_v51, %v818_v48 }
 0x111   : > { %893 = vadd.xlane.f32.xlu0 %v864_v49 }
 0x112   : > { %v858_v58 = vmul.f32 %v1573_v50, %v1573_v50  ;;  %v866_v59 = vmul.f32 %v1580_v57, %v1580_v57 }
 0x114   : > { %895 = vadd.xlane.f32.xlu1 %v865_v56 }
 0x115   : > { %881 = vadd.xlane.f32.xlu0 %v858_v58 }
 0x119   : > { %897 = vadd.xlane.f32.xlu0 %v866_v59 }
 0x181   : > { %v884_v61 = vpop.xlane.xlu1 %883  ;;  %v868_v62 = vpop.xlane.xlu0 %867 }
 0x182   : > { %v907_v52 = vmax.f32 %v884_v61, 1e-24  ;;  %v899_v63 = vmax.f32 %v868_v62, 1e-24 }
 0x184   : > { %1286 = vrsqrt.f32 %v907_v52 }
 0x185   : > { %1288 = vrsqrt.f32 %v899_v63  ;;  %v870_v0 = vpop.xlane.xlu1 %869 }
 0x186   : > { %v900_v1 = vmax.f32 %v870_v0, 1e-24  ;;  %v886_v2 = vpop.xlane.xlu0 %885 }
 0x187   : > { %v908_v3 = vmax.f32 %v886_v2, 1e-24 }
 0x188   : > { %1290 = vrsqrt.f32 %v900_v1 }
 0x189   : > { %1292 = vrsqrt.f32 %v908_v3  ;;  %v888_v4 = vpop.xlane.xlu1 %887 }
 0x18a   : > { %v909_v6 = vmax.f32 %v888_v4, 1e-24  ;;  %v872_v7 = vpop.xlane.xlu0 %871 }
 0x18b   : > { %v901_v8 = vmax.f32 %v872_v7, 1e-24 }
 0x18c   : > { %1294 = vrsqrt.f32 %v909_v6 }
 0x18d   : > { %1296 = vrsqrt.f32 %v901_v8 }
 0x18e   : > { %v874_v10 = vpop.xlane.xlu0 %873 }
 0x18f   : > { %v902_v13 = vmax.f32 %v874_v10, 1e-24 }
 0x191   : > { %v1287_v14 = vpop.eup %1286  ;;  %1298 = vrsqrt.f32 %v902_v13  ;;  %v876_v15 = vpop.xlane.xlu1 %875 }
 0x192   : > { %v1289_v53 = vpop.eup %1288  ;;  %v939_v16 = vmul.f32 %v1287_v14, %v1501_v11  ;;  %v903_v18 = vmax.f32 %v876_v15, 1e-24  ;;  %v890_v19 = vpop.xlane.xlu0 %889 }
 0x193   : > { %v931_v20 = vmul.f32 %v1289_v53, %v1503_v12  ;;  %v910_v21 = vmax.f32 %v890_v19, 1e-24 }
 0x194   : > { %v955_v22 = vmax.f32 %v939_v16, 0.0  ;;  %1300 = vrsqrt.f32 %v903_v18 }
 0x195   : > { %v1291_v23 = vpop.eup %1290  ;;  %v947_v24 = vmax.f32 %v931_v20, 0.0  ;;  %1302 = vrsqrt.f32 %v910_v21  ;;  %v892_v54 = vpop.xlane.xlu1 %891 }
 0x196   : > { %v1293_v11 = vpop.eup %1292  ;;  %971 = vst [vmem:[%s1589_s19 + $0x40] sm:$0xff] %v955_v22  ;;  %v932_v27 = vmul.f32 %v1291_v23, %v1511_v26  ;;  %v911_v28 = vmax.f32 %v892_v54, 1e-24  ;;  %v878_v30 = vpop.xlane.xlu0 %877 }
 0x197   : > { %963 = vst [vmem:[%s1589_s19] sm:$0xff] %v947_v24  ;;  %v940_v31 = vmul.f32 %v1293_v11, %v1513_v29  ;;  %v904_v32 = vmax.f32 %v878_v30, 1e-24 }
 0x198   : > { %v948_v12 = vmax.f32 %v932_v27, 0.0  ;;  %1304 = vrsqrt.f32 %v911_v28 }
 0x199   : > { %v1295_v33 = vpop.eup %1294  ;;  %v956_v34 = vmax.f32 %v940_v31, 0.0  ;;  %1306 = vrsqrt.f32 %v904_v32  ;;  %v880_v35 = vpop.xlane.xlu1 %879 }
 0x19a   : > { %v1297_v36 = vpop.eup %1296  ;;  %964 = vst [vmem:[%s1589_s19 + $0x8] sm:$0xff] %v948_v12  ;;  %v941_v38 = vmul.f32 %v1295_v33, %v1521_v40  ;;  %v905_v26 = vmax.f32 %v880_v35, 1e-24  ;;  %v894_v39 = vpop.xlane.xlu0 %893 }
 0x19b   : > { %972 = vst [vmem:[%s1589_s19 + $0x48] sm:$0xff] %v956_v34  ;;  %v933_v42 = vmul.f32 %v1297_v36, %v1523_v41  ;;  %v912_v55 = vmax.f32 %v894_v39, 1e-24 }
 0x19c   : > { %v957_v29 = vmax.f32 %v941_v38, 0.0  ;;  %1308 = vrsqrt.f32 %v905_v26 }
 0x19d   : > { %v949_v44 = vmax.f32 %v933_v42, 0.0  ;;  %1310 = vrsqrt.f32 %v912_v55  ;;  %v896_v45 = vpop.xlane.xlu1 %895 }
 0x19e   : > { %v1299_v46 = vpop.eup %1298  ;;  %973 = vst [vmem:[%s1589_s19 + $0x50] sm:$0xff] %v957_v29  ;;  %v913_v48 = vmax.f32 %v896_v45, 1e-24  ;;  %v882_v49 = vpop.xlane.xlu0 %881 }
 0x19f   : > { %965 = vst [vmem:[%s1589_s19 + $0x10] sm:$0xff] %v949_v44  ;;  %v934_v51 = vmul.f32 %v1299_v46, %v1531_v60  ;;  %v906_v40 = vmax.f32 %v882_v49, 1e-24 }
 0x1a0   : > { %1312 = vrsqrt.f32 %v913_v48 }
 0x1a1   : > { %v1301_v56 = vpop.eup %1300  ;;  %v950_v41 = vmax.f32 %v934_v51, 0.0  ;;  %1314 = vrsqrt.f32 %v906_v40 }
 0x1a2   : > { %v1303_v58 = vpop.eup %1302  ;;  %v935_v59 = vmul.f32 %v1301_v56, %v1541_v9  ;;  %v898_v61 = vpop.xlane.xlu0 %897 }
 0x1a3   : > { %966 = vst [vmem:[%s1589_s19 + $0x18] sm:$0xff] %v950_v41  ;;  %v942_v62 = vmul.f32 %v1303_v58, %v1538_v5  ;;  %v914_v52 = vmax.f32 %v898_v61, 1e-24 }
 0x1a4   : > { %v951_v63 = vmax.f32 %v935_v59, 0.0 }
 0x1a5   : > { %v1305_v0 = vpop.eup %1304  ;;  %v958_v60 = vmax.f32 %v942_v62, 0.0  ;;  %1316 = vrsqrt.f32 %v914_v52 }
 0x1a6   : > { %v1307_v1 = vpop.eup %1306  ;;  %967 = vst [vmem:[%s1589_s19 + $0x20] sm:$0xff] %v951_v63  ;;  %v943_v2 = vmul.f32 %v1305_v0, %v1547_v17 }
 0x1a7   : > { %974 = vst [vmem:[%s1589_s19 + $0x58] sm:$0xff] %v958_v60  ;;  %v936_v9 = vmul.f32 %v1307_v1, %v1551_v25 }
 0x1a8   : > { %v959_v3 = vmax.f32 %v943_v2, 0.0 }
 0x1a9   : > { %v1309_v4 = vpop.eup %1308  ;;  %v952_v6 = vmax.f32 %v936_v9, 0.0 }
 0x1aa   : > { %v1311_v7 = vpop.eup %1310  ;;  %975 = vst [vmem:[%s1589_s19 + $0x60] sm:$0xff] %v959_v3  ;;  %v937_v5 = vmul.f32 %v1309_v4, %v1563_v43 }
 0x1ab   : > { %968 = vst [vmem:[%s1589_s19 + $0x28] sm:$0xff] %v952_v6  ;;  %v944_v8 = vmul.f32 %v1311_v7, %v1560_v37 }
 0x1ac   : > { %v953_v10 = vmax.f32 %v937_v5, 0.0 }
 0x1ad   : > { %v1313_v13 = vpop.eup %1312  ;;  %v960_v17 = vmax.f32 %v944_v8, 0.0 }
 0x1ae   : > { %v1315_v14 = vpop.eup %1314  ;;  %969 = vst [vmem:[%s1589_s19 + $0x30] sm:$0xff] %v953_v10  ;;  %v945_v25 = vmul.f32 %v1313_v13, %v1569_v47 }
 0x1af   : > { %976 = vst [vmem:[%s1589_s19 + $0x68] sm:$0xff] %v960_v17  ;;  %v938_v15 = vmul.f32 %v1315_v14, %v1573_v50 }
 0x1b0   : > { %v961_v53 = vmax.f32 %v945_v25, 0.0 }
 0x1b1   : > { %v954_v16 = vmax.f32 %v938_v15, 0.0 }
 0x1b2   : > { %v1317_v18 = vpop.eup %1316  ;;  %977 = vst [vmem:[%s1589_s19 + $0x70] sm:$0xff] %v961_v53 }
 0x1b3   : > { %970 = vst [vmem:[%s1589_s19 + $0x38] sm:$0xff] %v954_v16  ;;  %v946_v43 = vmul.f32 %v1317_v18, %v1580_v57 }
 0x1b5   : > { %v962_v19 = vmax.f32 %v946_v43, 0.0 }
 0x1b7   : > { %978 = vst [vmem:[%s1589_s19 + $0x78] sm:$0xff] %v962_v19 }
 0x1b8 PF: > { %s14_s17 = sadd.s32 1, %s1340_s17   ;;  %s1636_s15 = smov %s1336_s16 }
 0x1b9   : > { %p11_p5 = scmp.ge.s32.totalorder %s14_s17, 4   ;;  %s1637_s16 = smov %s1639_s18 }
 0x1bb   :  { %13 = sbr.rel (!%p11_p5) target bundleno = 2 (0x2), region = 83 }

</bundles_post_ra>
